<compile_context>
chip_gen: v7x
topology: tpu7x:2x2x1
jax: 0.10.0
libtpu: 0.0.40
codegen_flags: <defaults>
</compile_context>

<pallas_src>
import functools
import math

import jax
import jax.numpy as jnp
from jax.experimental import pallas as pl
from jax.experimental.pallas import tpu as pltpu

_INV_SQRT2 = 1.0 / math.sqrt(2.0)


def _gelu_exact(x):
    # PyTorch nn.GELU() default (approximate='none'): 0.5*x*(1+erf(x/sqrt(2)))
    return 0.5 * x * (1.0 + jax.lax.erf(x * _INV_SQRT2))


def _gelu_tanh(x):
    # tanh approximation: runs on the EUP (idle bundle slot next to the MXU).
    return jax.nn.gelu(x, approximate=True)


def _round_up(x, m):
    return ((x + m - 1) // m) * m


def _vmem_limits():
    """(vmem_limit_bytes, tile-selection budget) sized to this TPU generation."""
    cap = 64 * 1024 * 1024  # conservative default == v7x per-TC physical VMEM
    try:
        info = pltpu.get_tpu_info()
        cap = int(getattr(info, "vmem_capacity_bytes", cap)) or cap
    except Exception:
        pass
    limit = max(min(int(cap * 0.80), cap - (8 << 20)), 16 << 20)
    budget = int(limit * 0.85)
    return limit, budget


def _choose_kc(h4, requested):
    """K-chunk width over the 4H axis: lane-aligned divisor of 4H (<= requested)."""
    for kc in (512, 384, 256, 128):
        if kc <= requested and h4 % kc == 0:
            return kc
    return h4  # tiny / odd configs: single chunk


def _choose_block_m(m, h, requested, in_bytes, out_bytes, wt_bytes, kc, budget, weight_bufs):
    """Largest MXU/sublane-friendly M-tile whose VMEM footprint fits the budget."""
    h4 = 4 * h
    w_bytes = weight_bufs * ((h * h4 + h4 * h) * wt_bytes + (h4 + h) * 4)

    def fits(tm):
        io = 2 * tm * h * (in_bytes + out_bytes)   # double-buffered x / out tiles
        acc = tm * h * 4                           # f32 accumulator scratch
        mid = 3 * tm * kc * 4                      # per-chunk fc1 activation + cast headroom
        return w_bytes + io + acc + mid <= budget

    cap = min(_round_up(requested, 8), _round_up(m, 8))
    if m >= 1024:
        # keep >= 4 grid steps so the pipeline has work to overlap and both v7x TCs are fed
        cap = min(cap, max(128, _round_up(pl.cdiv(m, 4), 16)))
    for tm in (512, 384, 256, 128, 64, 32, 16, 8):
        if tm <= cap and fits(tm):
            return tm
    return 8


def mlp_kernel(x_ref, w1_ref, b1_ref, w2_ref, b2_ref, o_ref, acc_ref, *,
               nk, kc, approximate_gelu):
    """One M-tile of fc2(GELU(fc1(x))); dropout is eval-mode identity.

    x_ref:  [TM, H]   (original dtype; cast to the weight dtype in-kernel)
    w1_ref: [H, 4H]   b1_ref: [1, 4H]   (weights in compute dtype, biases f32)
    w2_ref: [4H, H]   b2_ref: [1, H]
    acc_ref:[TM, H]   f32 accumulator scratch
    """
    gelu = _gelu_tanh if approximate_gelu else _gelu_exact
    # In-kernel cast (no-op for the f32 path): hidden under the MXU, avoids an extra
    # HBM read+write pass that a wrapper-level astype would cost.
    x = x_ref[...].astype(w1_ref.dtype)
    acc_ref[...] = jnp.zeros_like(acc_ref)

    # Chunk the 4H intermediate: per chunk, MXU (fc1) -> VPU/EUP (bias+GELU+cast) ->
    # MXU (fc2 accumulate). Fully unrolled static loop; slices are lane/sublane aligned
    # (kc is a multiple of 128 whenever 4H is), so they are zero-cost views.
    for k in range(nk):
        lo = k * kc
        h = jnp.dot(x, w1_ref[:, lo:lo + kc], preferred_element_type=jnp.float32)
        h = gelu(h + b1_ref[:, lo:lo + kc])            # bias + GELU in f32
        acc_ref[...] += jnp.dot(h.astype(w2_ref.dtype), w2_ref[lo:lo + kc, :],
                                preferred_element_type=jnp.float32)

    # Dropout: nn.Dropout is identity in eval mode; implemented as identity here.
    # TODO(synk): training-mode dropout would use pltpu.prng_seed + pltpu.prng_random_bits
    # with a per-tile seed offset so the mask differs across grid steps.
    o_ref[...] = (acc_ref[...] + b2_ref[...]).astype(o_ref.dtype)


def mlp_forward(x, w1, b1, w2, b2, *, block_m=512, block_k=512, use_bf16=True,
                approximate_gelu=False, out_dtype=None):
    """x: [B, S, H]. w1: [H, 4H], b1: [1, 4H], w2: [4H, H], b2: [1, H]. Returns [B, S, H]."""
    B, S, H = x.shape
    H4 = 4 * H
    M = B * S
    out_dtype = x.dtype if out_dtype is None else out_dtype

    compute_dtype = jnp.bfloat16 if use_bf16 else x.dtype
    # Weight casts are no-ops if callers already pass compute-dtype weights; under jit
    # they constant-fold, so nothing is re-materialized per call.
    w1c = w1.astype(compute_dtype)
    w2c = w2.astype(compute_dtype)
    b1c = b1.astype(jnp.float32)
    b2c = b2.astype(jnp.float32)
    x2d = x.reshape(M, H)            # no wrapper dtype cast and no padding pass

    in_bytes = jnp.dtype(x.dtype).itemsize
    out_bytes = jnp.dtype(out_dtype).itemsize
    wt_bytes = jnp.dtype(compute_dtype).itemsize

    vmem_limit, vmem_budget = _vmem_limits()
    kc = _choose_kc(H4, block_k)
    nk = H4 // kc

    kernel = functools.partial(mlp_kernel, nk=nk, kc=kc,
                               approximate_gelu=approximate_gelu)

    cost = pl.CostEstimate(
        flops=4 * M * H * H4,                           # two MXU matmuls
        transcendentals=M * H4,                         # one erf/tanh per intermediate elem
        bytes_accessed=(M * H * (in_bytes + out_bytes)
                        + (H * H4 + H4 * H) * wt_bytes + (H4 + H) * 4),
    )

    def run(single_buffer_weights):
        tm = _choose_block_m(M, H, block_m, in_bytes, out_bytes, wt_bytes, kc,
                             vmem_budget, 1 if single_buffer_weights else 2)
        grid = (pl.cdiv(M, tm),)     # ragged last tile handled by Pallas edge-block masking
        wkw = ({"pipeline_mode": pl.Buffered(1)} if single_buffer_weights else {})

        out2d = pl.pallas_call(
            kernel,
            out_shape=jax.ShapeDtypeStruct((M, H), out_dtype),
            grid_spec=pltpu.PrefetchScalarGridSpec(
                num_scalar_prefetch=0,
                grid=grid,
                in_specs=[
                    pl.BlockSpec((tm, H), lambda i: (i, 0)),          # x tile (pipelined)
                    pl.BlockSpec((H, H4), lambda i: (0, 0), **wkw),   # w1 (VMEM-resident)
                    pl.BlockSpec((1, H4), lambda i: (0, 0), **wkw),   # b1
                    pl.BlockSpec((H4, H), lambda i: (0, 0), **wkw),   # w2 (VMEM-resident)
                    pl.BlockSpec((1, H), lambda i: (0, 0), **wkw),    # b2
                ],
                out_specs=pl.BlockSpec((tm, H), lambda i: (i, 0)),
                scratch_shapes=[pltpu.VMEM((tm, H), jnp.float32)],    # f32 fc2 accumulator
            ),
            compiler_params=pltpu.CompilerParams(
                dimension_semantics=("parallel",),                    # both TCs on v7x
                vmem_limit_bytes=vmem_limit,
            ),
            cost_estimate=cost,
        )(x2d, w1c, b1c, w2c, b2c)
        return out2d.reshape(B, S, H)

    try:
        return run(single_buffer_weights=True)
    except Exception:
        # Fallback for jax versions where pipeline_mode=pl.Buffered(1) is not accepted
        # on top-level pallas_call BlockSpecs: plain double-buffered weight specs.
        return run(single_buffer_weights=False)


def _init_linear(key, fan_in, fan_out):
    # Deterministic init mimicking nn.Linear's kaiming-uniform / uniform bias.
    kw, kb = jax.random.split(key)
    bound = 1.0 / math.sqrt(fan_in)
    w = jax.random.uniform(kw, (fan_in, fan_out), jnp.float32, -bound, bound)
    b = jax.random.uniform(kb, (1, fan_out), jnp.float32, -bound, bound)
    return w, b


def _reference(x, w1, b1, w2, b2):
    B, S, H = x.shape
    h = _gelu_exact(jnp.dot(x.reshape(-1, H), w1) + b1)
    y = jnp.dot(h, w2) + b2
    return y.reshape(B, S, H)


if __name__ == "__main__":
    # Small config consistent with the module: batch=2, seq=8, hidden=32 (4*hidden=128).
    B, S, H = 2, 8, 32

    key = jax.random.PRNGKey(0)
    kx, k1, k2, k3, k4 = jax.random.split(key, 5)

    x = jax.random.normal(kx, (B, S, H), dtype=jnp.float32)
    w1, b1 = _init_linear(k1, H, 4 * H)
    w2, b2 = _init_linear(k2, 4 * H, H)
    ref = _reference(x, w1, b1, w2, b2)

    # 1) f32 path, exact GELU: tight match vs the reference.
    out_f32 = jax.block_until_ready(
        mlp_forward(x, w1, b1, w2, b2, use_bf16=False, approximate_gelu=False))
    assert jnp.allclose(out_f32, ref, atol=1e-5, rtol=1e-5), "f32 kernel mismatch"

    # 2) Default bf16 MXU path: looser tolerance vs the f32 reference.
    out_bf16 = jax.block_until_ready(mlp_forward(x, w1, b1, w2, b2, use_bf16=True))
    assert jnp.allclose(out_bf16, ref, atol=5e-2, rtol=5e-2), "bf16 kernel mismatch"

    # 3) Ragged M (24 rows, block_m=16 -> 2 grid steps, masked last tile), f32 path.
    B2, S2 = 2, 12
    x2 = jax.random.normal(kx, (B2, S2, H), dtype=jnp.float32)
    ref2 = _reference(x2, w1, b1, w2, b2)
    out2 = jax.block_until_ready(
        mlp_forward(x2, w1, b1, w2, b2, block_m=16, use_bf16=False))
    assert jnp.allclose(out2, ref2, atol=1e-5, rtol=1e-5), "ragged-tile kernel mismatch"

    # 4) Larger hidden to exercise the K-chunked loop (4H=1024, kc=256 -> 4 chunks),
    #    tanh-GELU on the EUP and bf16 output writeback.
    H3 = 256
    x3 = jax.random.normal(k3, (B, S, H3), dtype=jnp.float32)
    w1b, b1b = _init_linear(k4, H3, 4 * H3)
    w2b, b2b = _init_linear(k3, 4 * H3, H3)
    ref3 = _reference(x3, w1b, b1b, w2b, b2b)
    out3 = jax.block_until_ready(
        mlp_forward(x3, w1b, b1b, w2b, b2b, block_k=256, use_bf16=True,
                    approximate_gelu=True, out_dtype=jnp.bfloat16))
    assert jnp.allclose(out3.astype(jnp.float32), ref3, atol=5e-2, rtol=5e-2), \
        "chunked-K kernel mismatch"

    print("KERNEL_OK")
</pallas_src>

<mosaic_0001>
module attributes {stable_mosaic.version = 11 : i64} {
  func.func @mlp_kernel(%arg0: i32, %arg1: memref<16x32xf32, #tpu.memory_space<vmem>>, %arg2: memref<32x128xf32, #tpu.memory_space<vmem>>, %arg3: memref<1x128xf32, #tpu.memory_space<vmem>>, %arg4: memref<128x32xf32, #tpu.memory_space<vmem>>, %arg5: memref<1x32xf32, #tpu.memory_space<vmem>>, %arg6: memref<16x32xf32, #tpu.memory_space<vmem>>, %arg7: memref<16x32xf32, #tpu.memory_space<vmem>>) attributes {dimension_semantics = [#tpu.dimension_semantics<parallel>], iteration_bounds = array<i64: 1>, scalar_prefetch = 0 : i64, scratch_operands = 1 : i64, tpu.core_type = #tpu.core_type<tc>, window_params = [{transform_indices = @transform_0, window_bounds = array<i64: 16, 32>}, {pipeline_mode = #tpu.pipeline_mode<synchronous>, transform_indices = @transform_1, window_bounds = array<i64: 32, 128>}, {pipeline_mode = #tpu.pipeline_mode<synchronous>, transform_indices = @transform_2, window_bounds = array<i64: 1, 128>}, {pipeline_mode = #tpu.pipeline_mode<synchronous>, transform_indices = @transform_3, window_bounds = array<i64: 128, 32>}, {pipeline_mode = #tpu.pipeline_mode<synchronous>, transform_indices = @transform_4, window_bounds = array<i64: 1, 32>}, {transform_indices = @transform_5, window_bounds = array<i64: 16, 32>}]} {
    %c0 = arith.constant 0 : index
    %c0_0 = arith.constant 0 : index
    %0 = vector.load %arg1[%c0, %c0_0] : memref<16x32xf32, #tpu.memory_space<vmem>>, vector<16x32xf32>
    %cst = arith.constant 0.000000e+00 : f32
    %1 = vector.broadcast %cst : f32 to vector<16x32xf32>
    %c0_1 = arith.constant 0 : index
    %c0_2 = arith.constant 0 : index
    %2 = vector.load %arg7[%c0_1, %c0_2] : memref<16x32xf32, #tpu.memory_space<vmem>>, vector<16x32xf32>
    tpu.vector_store %arg7[%c0_1, %c0_2], %1 {strides = array<i32>} : memref<16x32xf32, #tpu.memory_space<vmem>>, vector<16x32xf32>,
    %c0_3 = arith.constant 0 : index
    %c0_4 = arith.constant 0 : index
    %3 = vector.load %arg2[%c0_3, %c0_4] : memref<32x128xf32, #tpu.memory_space<vmem>>, vector<32x128xf32>
    %cst_5 = arith.constant dense<0.000000e+00> : vector<16x128xf32>
    %4 = tpu.matmul %0, %3, %cst_5 {dimension_numbers = #tpu.dot_dimension_numbers<[1], [0], [0], [1], [0, 0, 1, 1], [], []>} : vector<16x32xf32>, vector<32x128xf32>, vector<16x128xf32> -> vector<16x128xf32>
    %c0_6 = arith.constant 0 : index
    %c0_7 = arith.constant 0 : index
    %5 = vector.load %arg3[%c0_6, %c0_7] : memref<1x128xf32, #tpu.memory_space<vmem>>, vector<1x128xf32>
    %6 = vector.broadcast %5 : vector<1x128xf32> to vector<16x128xf32>
    %7 = arith.addf %4, %6 : vector<16x128xf32>
    %cst_8 = arith.constant 5.000000e-01 : f32
    %8 = vector.broadcast %cst_8 : f32 to vector<16x128xf32>
    %9 = arith.mulf %8, %7 : vector<16x128xf32>
    %cst_9 = arith.constant 0.707106769 : f32
    %10 = vector.broadcast %cst_9 : f32 to vector<16x128xf32>
    %11 = arith.mulf %7, %10 : vector<16x128xf32>
    %12 = math.erf %11 : vector<16x128xf32>
    %cst_10 = arith.constant 1.000000e+00 : f32
    %13 = vector.broadcast %cst_10 : f32 to vector<16x128xf32>
    %14 = arith.addf %13, %12 : vector<16x128xf32>
    %15 = arith.mulf %9, %14 : vector<16x128xf32>
    %c0_11 = arith.constant 0 : index
    %c0_12 = arith.constant 0 : index
    %16 = vector.load %arg7[%c0_11, %c0_12] : memref<16x32xf32, #tpu.memory_space<vmem>>, vector<16x32xf32>
    %c0_13 = arith.constant 0 : index
    %c0_14 = arith.constant 0 : index
    %17 = vector.load %arg4[%c0_13, %c0_14] : memref<128x32xf32, #tpu.memory_space<vmem>>, vector<128x32xf32>
    %cst_15 = arith.constant dense<0.000000e+00> : vector<16x32xf32>
    %18 = tpu.matmul %15, %17, %cst_15 {dimension_numbers = #tpu.dot_dimension_numbers<[1], [0], [0], [1], [0, 0, 1, 1], [], []>} : vector<16x128xf32>, vector<128x32xf32>, vector<16x32xf32> -> vector<16x32xf32>
    %19 = arith.addf %16, %18 : vector<16x32xf32>
    %c0_16 = arith.constant 0 : index
    %c0_17 = arith.constant 0 : index
    %20 = vector.load %arg7[%c0_16, %c0_17] : memref<16x32xf32, #tpu.memory_space<vmem>>, vector<16x32xf32>
    tpu.vector_store %arg7[%c0_16, %c0_17], %19 {strides = array<i32>} : memref<16x32xf32, #tpu.memory_space<vmem>>, vector<16x32xf32>,
    %c0_18 = arith.constant 0 : index
    %c0_19 = arith.constant 0 : index
    %21 = vector.load %arg7[%c0_18, %c0_19] : memref<16x32xf32, #tpu.memory_space<vmem>>, vector<16x32xf32>
    %c0_20 = arith.constant 0 : index
    %c0_21 = arith.constant 0 : index
    %22 = vector.load %arg5[%c0_20, %c0_21] : memref<1x32xf32, #tpu.memory_space<vmem>>, vector<1x32xf32>
    %23 = vector.broadcast %22 : vector<1x32xf32> to vector<16x32xf32>
    %24 = arith.addf %21, %23 : vector<16x32xf32>
    %c0_22 = arith.constant 0 : index
    %c0_23 = arith.constant 0 : index
    %25 = vector.load %arg6[%c0_22, %c0_23] : memref<16x32xf32, #tpu.memory_space<vmem>>, vector<16x32xf32>
    tpu.vector_store %arg6[%c0_22, %c0_23], %24 {strides = array<i32>} : memref<16x32xf32, #tpu.memory_space<vmem>>, vector<16x32xf32>,
    return
  }
  func.func @transform_0(%arg0: i32) -> (i32, i32) {
    %c0_i32 = arith.constant 0 : i32
    %c0_i32_0 = arith.constant 0 : i32
    return %arg0, %c0_i32 : i32, i32
  }
  func.func @transform_1(%arg0: i32) -> (i32, i32) {
    %c0_i32 = arith.constant 0 : i32
    %c0_i32_0 = arith.constant 0 : i32
    %c0_i32_1 = arith.constant 0 : i32
    return %c0_i32, %c0_i32_0 : i32, i32
  }
  func.func @transform_2(%arg0: i32) -> (i32, i32) {
    %c0_i32 = arith.constant 0 : i32
    %c0_i32_0 = arith.constant 0 : i32
    %c0_i32_1 = arith.constant 0 : i32
    return %c0_i32, %c0_i32_0 : i32, i32
  }
  func.func @transform_3(%arg0: i32) -> (i32, i32) {
    %c0_i32 = arith.constant 0 : i32
    %c0_i32_0 = arith.constant 0 : i32
    %c0_i32_1 = arith.constant 0 : i32
    return %c0_i32, %c0_i32_0 : i32, i32
  }
  func.func @transform_4(%arg0: i32) -> (i32, i32) {
    %c0_i32 = arith.constant 0 : i32
    %c0_i32_0 = arith.constant 0 : i32
    %c0_i32_1 = arith.constant 0 : i32
    return %c0_i32, %c0_i32_0 : i32, i32
  }
  func.func @transform_5(%arg0: i32) -> (i32, i32) {
    %c0_i32 = arith.constant 0 : i32
    %c0_i32_0 = arith.constant 0 : i32
    return %arg0, %c0_i32 : i32, i32
  }
}

module attributes {stable_mosaic.version = 11 : i64} {
  func.func @mlp_kernel(%arg0: i32, %arg1: memref<16x32xf32, #tpu.memory_space<vmem>>, %arg2: memref<32x128xf32, #tpu.memory_space<vmem>>, %arg3: memref<1x128xf32, #tpu.memory_space<vmem>>, %arg4: memref<128x32xf32, #tpu.memory_space<vmem>>, %arg5: memref<1x32xf32, #tpu.memory_space<vmem>>, %arg6: memref<16x32xf32, #tpu.memory_space<vmem>>, %arg7: memref<16x32xf32, #tpu.memory_space<vmem>>) attributes {dimension_semantics = [#tpu.dimension_semantics<parallel>], iteration_bounds = array<i64: 1>, scalar_prefetch = 0 : i64, scratch_operands = 1 : i64, tpu.core_type = #tpu.core_type<tc>, window_params = [{transform_indices = @transform_0, window_bounds = array<i64: 16, 32>}, {pipeline_mode = #tpu.pipeline_mode<synchronous>, transform_indices = @transform_1, window_bounds = array<i64: 32, 128>}, {pipeline_mode = #tpu.pipeline_mode<synchronous>, transform_indices = @transform_2, window_bounds = array<i64: 1, 128>}, {pipeline_mode = #tpu.pipeline_mode<synchronous>, transform_indices = @transform_3, window_bounds = array<i64: 128, 32>}, {pipeline_mode = #tpu.pipeline_mode<synchronous>, transform_indices = @transform_4, window_bounds = array<i64: 1, 32>}, {transform_indices = @transform_5, window_bounds = array<i64: 16, 32>}]} {
    %c0 = arith.constant 0 : index
    %c0_0 = arith.constant 0 : index
    %0 = vector.load %arg1[%c0, %c0_0] : memref<16x32xf32, #tpu.memory_space<vmem>>, vector<16x32xf32>
    %cst = arith.constant 0.000000e+00 : f32
    %1 = vector.broadcast %cst : f32 to vector<16x32xf32>
    %c0_1 = arith.constant 0 : index
    %c0_2 = arith.constant 0 : index
    %2 = vector.load %arg7[%c0_1, %c0_2] : memref<16x32xf32, #tpu.memory_space<vmem>>, vector<16x32xf32>
    tpu.vector_store %arg7[%c0_1, %c0_2], %1 {strides = array<i32>} : memref<16x32xf32, #tpu.memory_space<vmem>>, vector<16x32xf32>,
    %c0_3 = arith.constant 0 : index
    %c0_4 = arith.constant 0 : index
    %3 = vector.load %arg2[%c0_3, %c0_4] : memref<32x128xf32, #tpu.memory_space<vmem>>, vector<32x128xf32>
    %cst_5 = arith.constant dense<0.000000e+00> : vector<16x128xf32>
    %4 = tpu.matmul %0, %3, %cst_5 {dimension_numbers = #tpu.dot_dimension_numbers<[1], [0], [0], [1], [0, 0, 1, 1], [], []>} : vector<16x32xf32>, vector<32x128xf32>, vector<16x128xf32> -> vector<16x128xf32>
    %c0_6 = arith.constant 0 : index
    %c0_7 = arith.constant 0 : index
    %5 = vector.load %arg3[%c0_6, %c0_7] : memref<1x128xf32, #tpu.memory_space<vmem>>, vector<1x128xf32>
    %6 = vector.broadcast %5 : vector<1x128xf32> to vector<16x128xf32>
    %7 = arith.addf %4, %6 : vector<16x128xf32>
    %cst_8 = arith.constant 5.000000e-01 : f32
    %8 = vector.broadcast %cst_8 : f32 to vector<16x128xf32>
    %9 = arith.mulf %8, %7 : vector<16x128xf32>
    %cst_9 = arith.constant 0.707106769 : f32
    %10 = vector.broadcast %cst_9 : f32 to vector<16x128xf32>
    %11 = arith.mulf %7, %10 : vector<16x128xf32>
    %12 = math.erf %11 : vector<16x128xf32>
    %cst_10 = arith.constant 1.000000e+00 : f32
    %13 = vector.broadcast %cst_10 : f32 to vector<16x128xf32>
    %14 = arith.addf %13, %12 : vector<16x128xf32>
    %15 = arith.mulf %9, %14 : vector<16x128xf32>
    %c0_11 = arith.constant 0 : index
    %c0_12 = arith.constant 0 : index
    %16 = vector.load %arg7[%c0_11, %c0_12] : memref<16x32xf32, #tpu.memory_space<vmem>>, vector<16x32xf32>
    %c0_13 = arith.constant 0 : index
    %c0_14 = arith.constant 0 : index
    %17 = vector.load %arg4[%c0_13, %c0_14] : memref<128x32xf32, #tpu.memory_space<vmem>>, vector<128x32xf32>
    %cst_15 = arith.constant dense<0.000000e+00> : vector<16x32xf32>
    %18 = tpu.matmul %15, %17, %cst_15 {dimension_numbers = #tpu.dot_dimension_numbers<[1], [0], [0], [1], [0, 0, 1, 1], [], []>} : vector<16x128xf32>, vector<128x32xf32>, vector<16x32xf32> -> vector<16x32xf32>
    %19 = arith.addf %16, %18 : vector<16x32xf32>
    %c0_16 = arith.constant 0 : index
    %c0_17 = arith.constant 0 : index
    %20 = vector.load %arg7[%c0_16, %c0_17] : memref<16x32xf32, #tpu.memory_space<vmem>>, vector<16x32xf32>
    tpu.vector_store %arg7[%c0_16, %c0_17], %19 {strides = array<i32>} : memref<16x32xf32, #tpu.memory_space<vmem>>, vector<16x32xf32>,
    %c0_18 = arith.constant 0 : index
    %c0_19 = arith.constant 0 : index
    %21 = vector.load %arg7[%c0_18, %c0_19] : memref<16x32xf32, #tpu.memory_space<vmem>>, vector<16x32xf32>
    %c0_20 = arith.constant 0 : index
    %c0_21 = arith.constant 0 : index
    %22 = vector.load %arg5[%c0_20, %c0_21] : memref<1x32xf32, #tpu.memory_space<vmem>>, vector<1x32xf32>
    %23 = vector.broadcast %22 : vector<1x32xf32> to vector<16x32xf32>
    %24 = arith.addf %21, %23 : vector<16x32xf32>
    %c0_22 = arith.constant 0 : index
    %c0_23 = arith.constant 0 : index
    %25 = vector.load %arg6[%c0_22, %c0_23] : memref<16x32xf32, #tpu.memory_space<vmem>>, vector<16x32xf32>
    tpu.vector_store %arg6[%c0_22, %c0_23], %24 {strides = array<i32>} : memref<16x32xf32, #tpu.memory_space<vmem>>, vector<16x32xf32>,
    return
  }
  func.func @transform_0(%arg0: i32) -> (i32, i32) {
    %c0_i32 = arith.constant 0 : i32
    %c0_i32_0 = arith.constant 0 : i32
    return %arg0, %c0_i32 : i32, i32
  }
  func.func @transform_1(%arg0: i32) -> (i32, i32) {
    %c0_i32 = arith.constant 0 : i32
    %c0_i32_0 = arith.constant 0 : i32
    %c0_i32_1 = arith.constant 0 : i32
    return %c0_i32, %c0_i32_0 : i32, i32
  }
  func.func @transform_2(%arg0: i32) -> (i32, i32) {
    %c0_i32 = arith.constant 0 : i32
    %c0_i32_0 = arith.constant 0 : i32
    %c0_i32_1 = arith.constant 0 : i32
    return %c0_i32, %c0_i32_0 : i32, i32
  }
  func.func @transform_3(%arg0: i32) -> (i32, i32) {
    %c0_i32 = arith.constant 0 : i32
    %c0_i32_0 = arith.constant 0 : i32
    %c0_i32_1 = arith.constant 0 : i32
    return %c0_i32, %c0_i32_0 : i32, i32
  }
  func.func @transform_4(%arg0: i32) -> (i32, i32) {
    %c0_i32 = arith.constant 0 : i32
    %c0_i32_0 = arith.constant 0 : i32
    %c0_i32_1 = arith.constant 0 : i32
    return %c0_i32, %c0_i32_0 : i32, i32
  }
  func.func @transform_5(%arg0: i32) -> (i32, i32) {
    %c0_i32 = arith.constant 0 : i32
    %c0_i32_0 = arith.constant 0 : i32
    return %arg0, %c0_i32 : i32, i32
  }
}

</mosaic_0001>

<bundles_post_ra>
// kernel: tpu_custom_call.1
= control target key start
LH: loop header
LB: loop body
LE: loop exit
PB: predicated region body
PF: predicated region fallthrough
CT: control target
= control target key end

     0   :  { %vm23_vm0 = vcmask 261120   ;;  %s526_s0 = inlined_call_operand.vmem [shape: f32[16,32], index: 0, kind: input, shape index: {}]   ;;  %s527_s1 = inlined_call_operand.vmem [shape: f32[32,128], index: 1, kind: input, shape index: {}]   ;;  %s528_s2 = inlined_call_operand.vmem [shape: f32[1,128], index: 2, kind: input, shape index: {}]   ;;  %s529_s3 = inlined_call_operand.vmem [shape: f32[128,32], index: 3, kind: input, shape index: {}]   ;;  %s530_s4 = inlined_call_operand.vmem [shape: f32[1,32], index: 4, kind: input, shape index: {}]   ;;  %s531_s5 = inlined_call_operand.hbm [shape: f32[16,32], index: 5, kind: output, shape index: {}]  }
   0x1   :  { %v26_v0 = vld [vmem:[%s527_s1] sm:$0xff]  ;;  %v27_v1 = vld [vmem:[%s527_s1 + $0x8] sm:$0xff]  ;;  %v28_v2 = vld [vmem:[%s527_s1 + $0x10] sm:$0xff] }
   0x2   :  { %v328_v3 = vpack.c.bf16 %v27_v1, %v26_v0  ;;  %v29_v4 = vld [vmem:[%s527_s1 + $0x18] sm:$0xff]  ;;  %v21_v5 = vld [vmem:[%s526_s0] sm:$0xff]  ;;  %v131_v8 = vld [vmem:[%s529_s3 + $0x8] sm:$0xff] }
   0x3   :  { %v332_v6 = vpack.c.bf16 %v29_v4, %v28_v2  ;;  %290 = vmatprep.mubr.msk.f32.mxu0 %vm23_vm0, %v21_v5  ;;  %v130_v7 = vld [vmem:[%s529_s3] sm:$0xff]  ;;  %v132_v9 = vld [vmem:[%s529_s3 + $0x10] sm:$0xff]  ;;  %v133_v11 = vld [vmem:[%s529_s3 + $0x18] sm:$0xff] }
   0x4   :  { %329 = vmatprep.subr.bf16.mxu0 %v328_v3  ;;  %v336_v10 = vpack.c.bf16 %v131_v8, %v130_v7  ;;  %v340_v12 = vpack.c.bf16 %v133_v11, %v132_v9  ;;  %v134_v13 = vld [vmem:[%s529_s3 + $0x20] sm:$0xff]  ;;  %v135_v14 = vld [vmem:[%s529_s3 + $0x28] sm:$0xff] }
   0x5   :  { %331 = vmatpush3.bf16.msra.mxu0 %v328_v3 }
   0x6   :  { %10 = vsyncpa [#allocation4], 0  ;;  %333 = vmatprep.subr.bf16.mxu0 %v332_v6  ;;  %337 = vmatprep.subr.bf16.mxu1 %v336_v10  ;;  %v344_v15 = vpack.c.bf16 %v135_v14, %v134_v13  ;;  %v22_v16 = vld [vmem:[%s526_s0 + $0x8] sm:$0xff]  ;;  %v136_v17 = vld [vmem:[%s529_s3 + $0x30] sm:$0xff]  ;;  %v400_v32 = vmov 0.0   ;;  %s401_s11 = smov [#allocation3]  }
   0x7   :  { %339 = vmatpush3.bf16.msra.mxu1 %v336_v10  ;;  %v137_v18 = vld [vmem:[%s529_s3 + $0x38] sm:$0xff]  ;;  %v138_v20 = vld [vmem:[%s529_s3 + $0x40] sm:$0xff]  ;;  %v139_v21 = vld [vmem:[%s529_s3 + $0x48] sm:$0xff]  ;;  %25 = vst.msk [vmem:[#allocation2 + $0x8] sm:$0xff] %vm23_vm0, %v400_v32  ;;  %s243_s12 = sshll.u32 %s401_s11, 4  ;;  %s244_s12 = int_to_ptr.vmem [resolvable:$true] %s243_s12 }
   0x8   :  { %341 = vmatprep.subr.bf16.mxu1 %v340_v12  ;;  %v348_v19 = vpack.c.bf16 %v137_v18, %v136_v17  ;;  %v352_v22 = vpack.c.bf16 %v139_v21, %v138_v20  ;;  %v140_v23 = vld [vmem:[%s529_s3 + $0x50] sm:$0xff]  ;;  %v141_v24 = vld [vmem:[%s529_s3 + $0x58] sm:$0xff]  ;;  %v142_v26 = vld [vmem:[%s529_s3 + $0x60] sm:$0xff]  ;;  %24 = vst.msk [vmem:[#allocation2] sm:$0xff] %vm23_vm0, %v400_v32  ;;  %s376_s13 = scalar_lea.vmem %s244_s12, 256  ;;  %p381_p1 = scmp.lt.s32.totalorder %s244_s12, %s244_s12 }
   0x9   :  { %335 = vmatpush3.bf16.msra.mxu0 %v332_v6  ;;  %v356_v25 = vpack.c.bf16 %v141_v24, %v140_v23  ;;  %v143_v27 = vld [vmem:[%s529_s3 + $0x68] sm:$0xff]  ;;  %v144_v29 = vld [vmem:[%s529_s3 + $0x70] sm:$0xff]  ;;  %v145_v30 = vld [vmem:[%s529_s3 + $0x78] sm:$0xff]  ;;  %p377_p0 = scmp.ne.s32.totalorder %s244_s12, %s376_s13  ;;  %p382_p2 = scmp.lt.s32.totalorder %s376_s13, %s376_s13 }
   0xa   :  { %v360_v28 = vpack.c.bf16 %v143_v27, %v142_v26  ;;  %v364_v31 = vpack.c.bf16 %v145_v30, %v144_v29  ;;  %v254_v33 = vld [vmem:[%s528_s2] ss:$0 sm:$0xff] }
   0xb   :  { %343 = vmatpush3.bf16.msra.mxu1 %v340_v12  ;;  %v257_v54 = vld [vmem:[%s530_s4] ss:$0 sm:$0xff]  ;;  %p383_p3 = por %p382_p2, %p381_p1 }
   0xc   :  { %291 = vmatmul.mubr.msk.f32.vlgmr.msra.gmra.mrb[0].mxu0 %vm23_vm0, %v22_v16  ;;  %345 = vmatprep.subr.bf16.mxu1 %v344_v15 }
   0xd   :  { %p384_p4 = pnand %p383_p3, %p377_p0 }
   0xe   :  { %v129_v48 = vld [vmem:[#allocation2 + $0x8] sm:$0xff] }
   0xf   :  { %347 = vmatpush3.bf16.msra.mxu1 %v344_v15  ;;  %v128_v49 = vld [vmem:[#allocation2] sm:$0xff] }
  0x10   :  { %349 = vmatprep.subr.bf16.mxu1 %v348_v19 }
  0x13   :  { %351 = vmatpush3.bf16.msra.mxu1 %v348_v19 }
  0x14   :  { %353 = vmatprep.subr.bf16.mxu1 %v352_v22 }
  0x17   :  { %355 = vmatpush3.bf16.msra.mxu1 %v352_v22 }
  0x18   :  { %357 = vmatprep.subr.bf16.mxu1 %v356_v25 }
  0x1b   :  { %359 = vmatpush3.bf16.msra.mxu1 %v356_v25 }
  0x1c   :  { %361 = vmatprep.subr.bf16.mxu1 %v360_v28 }
  0x1f   :  { %363 = vmatpush3.bf16.msra.mxu1 %v360_v28 }
  0x20   :  { %365 = vmatprep.subr.bf16.mxu1 %v364_v31 }
  0x23   :  { %367 = vmatpush3.bf16.msra.mxu1 %v364_v31 }
  0xdf   :  { %v292_v34 = vpop.f32.mrb[0].mxu0 }
  0xe0   :  { %v115_v35 = vadd.f32 %v292_v34, %v254_v33  ;;  %v109_v36 = vpop.f32.mrb[1].mxu0 }
  0xe1   :  { %v110_v37 = vadd.f32 %v254_v33, %v109_v36 }
  0xe2   :  { %v121_v38 = vmul.f32 0.70710677, %v115_v35  ;;  %v119_v45 = vmul.f32 0.5, %v115_v35 }
  0xe3   :  { %v120_v39 = vmul.f32 0.70710677, %v110_v37  ;;  %v118_v43 = vmul.f32 0.5, %v110_v37 }
  0xe4   :  { %372 = verf.f32 %v121_v38 }
  0xe5   :  { %374 = verf.f32 %v120_v39 }
  0xee   :  { %v373_v40 = vpop.eup %372 }
  0xef   :  { %v375_v41 = vpop.eup %374  ;;  %v125_v42 = vadd.f32 1.0, %v373_v40 }
  0xf0   :  { %v124_v44 = vadd.f32 1.0, %v375_v41 }
  0xf1   :  { %v127_v47 = vmul.f32 %v125_v42, %v119_v45 }
  0xf2   :  { %v126_v46 = vmul.f32 %v124_v44, %v118_v43 }
  0xf4   :  { %325 = vmatprep.mubr.f32.mxu1 %v126_v46 }
  0xf5   :  { %326 = vmatmul.mubr.f32.vlgmr.msra.gmra.mrb[0].mxu1 %v127_v47 }
 0x1c8   :  { %v327_v50 = vpop.f32.mrb[0].mxu1 }
 0x1c9   :  { %v222_v51 = vadd.f32 %v327_v50, %v129_v48  ;;  %v212_v52 = vpop.f32.mrb[1].mxu1 }
 0x1ca   :  { %v221_v53 = vadd.f32 %v212_v52, %v128_v49 }
 0x1cb   :  { %224 = vst.msk [vmem:[#allocation2 + $0x8] sm:$0xff] %vm23_vm0, %v222_v51 }
 0x1cc   :  { %223 = vst.msk [vmem:[#allocation2] sm:$0xff] %vm23_vm0, %v221_v53 }
 0x1d2   :  { %v226_v55 = vld [vmem:[#allocation2 + $0x8] sm:$0xff] }
 0x1d3   :  { %v225_v56 = vld [vmem:[#allocation2] sm:$0xff]  ;;  %v235_v57 = vadd.f32 %v257_v54, %v226_v55 }
 0x1d4   :  { %v234_v58 = vadd.f32 %v257_v54, %v225_v56 }
 0x1d5   :  { %237 = vst.msk [vmem:[#allocation3 + $0x8] sm:$0xff] %vm23_vm0, %v235_v57 }
 0x1d6   :  { %236 = vst.msk [vmem:[#allocation3] sm:$0xff] %vm23_vm0, %v234_v58 }
 0x1d7   :  { %387 = shalt.err (!%p384_p4)
}
 0x1d8   :  { %s388_s15 = scalar_lea.hbm %s531_s5, 256 }
 0x1d9   :  { %p389_p5 = scmp.ne.s32.totalorder %s531_s5, %s388_s15  ;;  %p392_p6 = scmp.lt.u32.totalorder %s388_s15, %s531_s5 }
 0x1db   :  { %p394_p7 = pnand %p392_p6, %p389_p5 }
 0x1dd   :  { %397 = shalt.err (!%p394_p7)
}
 0x1de   :  { %s402_s20 = smov 128   ;;  %s403_s21 = smov 8  }
 0x1df   :  { %249 = dma.vmem_to_hbm [thread:$0]  %s244_s12, 256, %s531_s5, [#allocation4], %s402_s20, %s402_s20, %s403_s21  }
 0x1e0   :  { %398 = dma.done.wait [#allocation4], 256  }
 0x1e1   :  { %399 = vsyncadd [#allocation4], 4294967040 }
 0x1e2   :  { %253 = vsyncpa [#allocation4], 1 }

// kernel: tpu_custom_call.1
= control target key start
LH: loop header
LB: loop body
LE: loop exit
PB: predicated region body
PF: predicated region fallthrough
CT: control target
= control target key end

     0   :  { %vm23_vm0 = vcmask 261120   ;;  %s526_s0 = inlined_call_operand.vmem [shape: f32[16,32], index: 0, kind: input, shape index: {}]   ;;  %s527_s1 = inlined_call_operand.vmem [shape: f32[32,128], index: 1, kind: input, shape index: {}]   ;;  %s528_s2 = inlined_call_operand.vmem [shape: f32[1,128], index: 2, kind: input, shape index: {}]   ;;  %s529_s3 = inlined_call_operand.vmem [shape: f32[128,32], index: 3, kind: input, shape index: {}]   ;;  %s530_s4 = inlined_call_operand.vmem [shape: f32[1,32], index: 4, kind: input, shape index: {}]   ;;  %s531_s5 = inlined_call_operand.hbm [shape: f32[16,32], index: 5, kind: output, shape index: {}]  }
   0x1   :  { %v26_v0 = vld [vmem:[%s527_s1] sm:$0xff]  ;;  %v27_v1 = vld [vmem:[%s527_s1 + $0x8] sm:$0xff]  ;;  %v28_v2 = vld [vmem:[%s527_s1 + $0x10] sm:$0xff] }
   0x2   :  { %v328_v3 = vpack.c.bf16 %v27_v1, %v26_v0  ;;  %v29_v4 = vld [vmem:[%s527_s1 + $0x18] sm:$0xff]  ;;  %v21_v5 = vld [vmem:[%s526_s0] sm:$0xff]  ;;  %v131_v8 = vld [vmem:[%s529_s3 + $0x8] sm:$0xff] }
   0x3   :  { %v332_v6 = vpack.c.bf16 %v29_v4, %v28_v2  ;;  %290 = vmatprep.mubr.msk.f32.mxu0 %vm23_vm0, %v21_v5  ;;  %v130_v7 = vld [vmem:[%s529_s3] sm:$0xff]  ;;  %v132_v9 = vld [vmem:[%s529_s3 + $0x10] sm:$0xff]  ;;  %v133_v11 = vld [vmem:[%s529_s3 + $0x18] sm:$0xff] }
   0x4   :  { %329 = vmatprep.subr.bf16.mxu0 %v328_v3  ;;  %v336_v10 = vpack.c.bf16 %v131_v8, %v130_v7  ;;  %v340_v12 = vpack.c.bf16 %v133_v11, %v132_v9  ;;  %v134_v13 = vld [vmem:[%s529_s3 + $0x20] sm:$0xff]  ;;  %v135_v14 = vld [vmem:[%s529_s3 + $0x28] sm:$0xff] }
   0x5   :  { %331 = vmatpush3.bf16.msra.mxu0 %v328_v3 }
   0x6   :  { %10 = vsyncpa [#allocation4], 0  ;;  %333 = vmatprep.subr.bf16.mxu0 %v332_v6  ;;  %337 = vmatprep.subr.bf16.mxu1 %v336_v10  ;;  %v344_v15 = vpack.c.bf16 %v135_v14, %v134_v13  ;;  %v22_v16 = vld [vmem:[%s526_s0 + $0x8] sm:$0xff]  ;;  %v136_v17 = vld [vmem:[%s529_s3 + $0x30] sm:$0xff]  ;;  %v400_v32 = vmov 0.0   ;;  %s401_s11 = smov [#allocation3]  }
   0x7   :  { %339 = vmatpush3.bf16.msra.mxu1 %v336_v10  ;;  %v137_v18 = vld [vmem:[%s529_s3 + $0x38] sm:$0xff]  ;;  %v138_v20 = vld [vmem:[%s529_s3 + $0x40] sm:$0xff]  ;;  %v139_v21 = vld [vmem:[%s529_s3 + $0x48] sm:$0xff]  ;;  %25 = vst.msk [vmem:[#allocation2 + $0x8] sm:$0xff] %vm23_vm0, %v400_v32  ;;  %s243_s12 = sshll.u32 %s401_s11, 4  ;;  %s244_s12 = int_to_ptr.vmem [resolvable:$true] %s243_s12 }
   0x8   :  { %341 = vmatprep.subr.bf16.mxu1 %v340_v12  ;;  %v348_v19 = vpack.c.bf16 %v137_v18, %v136_v17  ;;  %v352_v22 = vpack.c.bf16 %v139_v21, %v138_v20  ;;  %v140_v23 = vld [vmem:[%s529_s3 + $0x50] sm:$0xff]  ;;  %v141_v24 = vld [vmem:[%s529_s3 + $0x58] sm:$0xff]  ;;  %v142_v26 = vld [vmem:[%s529_s3 + $0x60] sm:$0xff]  ;;  %24 = vst.msk [vmem:[#allocation2] sm:$0xff] %vm23_vm0, %v400_v32  ;;  %s376_s13 = scalar_lea.vmem %s244_s12, 256  ;;  %p381_p1 = scmp.lt.s32.totalorder %s244_s12, %s244_s12 }
   0x9   :  { %335 = vmatpush3.bf16.msra.mxu0 %v332_v6  ;;  %v356_v25 = vpack.c.bf16 %v141_v24, %v140_v23  ;;  %v143_v27 = vld [vmem:[%s529_s3 + $0x68] sm:$0xff]  ;;  %v144_v29 = vld [vmem:[%s529_s3 + $0x70] sm:$0xff]  ;;  %v145_v30 = vld [vmem:[%s529_s3 + $0x78] sm:$0xff]  ;;  %p377_p0 = scmp.ne.s32.totalorder %s244_s12, %s376_s13  ;;  %p382_p2 = scmp.lt.s32.totalorder %s376_s13, %s376_s13 }
   0xa   :  { %v360_v28 = vpack.c.bf16 %v143_v27, %v142_v26  ;;  %v364_v31 = vpack.c.bf16 %v145_v30, %v144_v29  ;;  %v254_v33 = vld [vmem:[%s528_s2] ss:$0 sm:$0xff] }
   0xb   :  { %343 = vmatpush3.bf16.msra.mxu1 %v340_v12  ;;  %v257_v54 = vld [vmem:[%s530_s4] ss:$0 sm:$0xff]  ;;  %p383_p3 = por %p382_p2, %p381_p1 }
   0xc   :  { %291 = vmatmul.mubr.msk.f32.vlgmr.msra.gmra.mrb[0].mxu0 %vm23_vm0, %v22_v16  ;;  %345 = vmatprep.subr.bf16.mxu1 %v344_v15 }
   0xd   :  { %p384_p4 = pnand %p383_p3, %p377_p0 }
   0xe   :  { %v129_v48 = vld [vmem:[#allocation2 + $0x8] sm:$0xff] }
   0xf   :  { %347 = vmatpush3.bf16.msra.mxu1 %v344_v15  ;;  %v128_v49 = vld [vmem:[#allocation2] sm:$0xff] }
  0x10   :  { %349 = vmatprep.subr.bf16.mxu1 %v348_v19 }
  0x13   :  { %351 = vmatpush3.bf16.msra.mxu1 %v348_v19 }
  0x14   :  { %353 = vmatprep.subr.bf16.mxu1 %v352_v22 }
  0x17   :  { %355 = vmatpush3.bf16.msra.mxu1 %v352_v22 }
  0x18   :  { %357 = vmatprep.subr.bf16.mxu1 %v356_v25 }
  0x1b   :  { %359 = vmatpush3.bf16.msra.mxu1 %v356_v25 }
  0x1c   :  { %361 = vmatprep.subr.bf16.mxu1 %v360_v28 }
  0x1f   :  { %363 = vmatpush3.bf16.msra.mxu1 %v360_v28 }
  0x20   :  { %365 = vmatprep.subr.bf16.mxu1 %v364_v31 }
  0x23   :  { %367 = vmatpush3.bf16.msra.mxu1 %v364_v31 }
  0xdf   :  { %v292_v34 = vpop.f32.mrb[0].mxu0 }
  0xe0   :  { %v115_v35 = vadd.f32 %v292_v34, %v254_v33  ;;  %v109_v36 = vpop.f32.mrb[1].mxu0 }
  0xe1   :  { %v110_v37 = vadd.f32 %v254_v33, %v109_v36 }
  0xe2   :  { %v121_v38 = vmul.f32 0.70710677, %v115_v35  ;;  %v119_v45 = vmul.f32 0.5, %v115_v35 }
  0xe3   :  { %v120_v39 = vmul.f32 0.70710677, %v110_v37  ;;  %v118_v43 = vmul.f32 0.5, %v110_v37 }
  0xe4   :  { %372 = verf.f32 %v121_v38 }
  0xe5   :  { %374 = verf.f32 %v120_v39 }
  0xee   :  { %v373_v40 = vpop.eup %372 }
  0xef   :  { %v375_v41 = vpop.eup %374  ;;  %v125_v42 = vadd.f32 1.0, %v373_v40 }
  0xf0   :  { %v124_v44 = vadd.f32 1.0, %v375_v41 }
  0xf1   :  { %v127_v47 = vmul.f32 %v125_v42, %v119_v45 }
  0xf2   :  { %v126_v46 = vmul.f32 %v124_v44, %v118_v43 }
  0xf4   :  { %325 = vmatprep.mubr.f32.mxu1 %v126_v46 }
  0xf5   :  { %326 = vmatmul.mubr.f32.vlgmr.msra.gmra.mrb[0].mxu1 %v127_v47 }
 0x1c8   :  { %v327_v50 = vpop.f32.mrb[0].mxu1 }
 0x1c9   :  { %v222_v51 = vadd.f32 %v327_v50, %v129_v48  ;;  %v212_v52 = vpop.f32.mrb[1].mxu1 }
 0x1ca   :  { %v221_v53 = vadd.f32 %v212_v52, %v128_v49 }
 0x1cb   :  { %224 = vst.msk [vmem:[#allocation2 + $0x8] sm:$0xff] %vm23_vm0, %v222_v51 }
 0x1cc   :  { %223 = vst.msk [vmem:[#allocation2] sm:$0xff] %vm23_vm0, %v221_v53 }
 0x1d2   :  { %v226_v55 = vld [vmem:[#allocation2 + $0x8] sm:$0xff] }
 0x1d3   :  { %v225_v56 = vld [vmem:[#allocation2] sm:$0xff]  ;;  %v235_v57 = vadd.f32 %v257_v54, %v226_v55 }
 0x1d4   :  { %v234_v58 = vadd.f32 %v257_v54, %v225_v56 }
 0x1d5   :  { %237 = vst.msk [vmem:[#allocation3 + $0x8] sm:$0xff] %vm23_vm0, %v235_v57 }
 0x1d6   :  { %236 = vst.msk [vmem:[#allocation3] sm:$0xff] %vm23_vm0, %v234_v58 }
 0x1d7   :  { %387 = shalt.err (!%p384_p4)
}
 0x1d8   :  { %s388_s15 = scalar_lea.hbm %s531_s5, 256 }
 0x1d9   :  { %p389_p5 = scmp.ne.s32.totalorder %s531_s5, %s388_s15  ;;  %p392_p6 = scmp.lt.u32.totalorder %s388_s15, %s531_s5 }
 0x1db   :  { %p394_p7 = pnand %p392_p6, %p389_p5 }
 0x1dd   :  { %397 = shalt.err (!%p394_p7)
}
 0x1de   :  { %s402_s20 = smov 128   ;;  %s403_s21 = smov 8  }
 0x1df   :  { %249 = dma.vmem_to_hbm [thread:$0]  %s244_s12, 256, %s531_s5, [#allocation4], %s402_s20, %s402_s20, %s403_s21  }
 0x1e0   :  { %398 = dma.done.wait [#allocation4], 256  }
 0x1e1   :  { %399 = vsyncadd [#allocation4], 4294967040 }
 0x1e2   :  { %253 = vsyncpa [#allocation4], 1 }

</bundles_post_ra>
